<compile_context>
chip_gen: v5e
topology: v5e:2x2
jax: 0.10.0
libtpu: 0.0.40
codegen_flags: <defaults>
</compile_context>

<pallas_src>
import jax
import jax.numpy as jnp
from jax.experimental import pallas as pl
from jax.experimental.pallas import tpu as pltpu

LANE = 128
# ~2 MiB input tile: with the output tile and double-buffering this is ~8 MiB of
# VMEM, safely inside the default scoped-VMEM limit on v5e/v6e/v7x while already
# sitting at ~85%+ of HBM roofline for a pure streaming kernel.
TARGET_TILE_BYTES = 2 * 1024 * 1024


def _make_kernel(clip_val, scale, zero_point, dequantize):
    clip_val = float(clip_val)
    scale = float(scale)
    inv_scale = 1.0 / scale
    zero_point = float(zero_point)

    def kernel(x_ref, o_ref):
        # Compute in f32 so round() hits the correct level even for bf16 inputs.
        x = x_ref[...].astype(jnp.float32)
        # clamp(x, 0, clip_val)
        x = jnp.clip(x, 0.0, clip_val)
        # linear_quantize: round(scale * x - zero_point)  (round-half-to-even == torch.round)
        q = jnp.round(scale * x - zero_point)
        if dequantize:
            # linear_dequantize: (q + zero_point) / scale
            q = (q + zero_point) * inv_scale
        o_ref[...] = q.astype(o_ref.dtype)

    return kernel


def _reference(x, num_bits, clip_val, dequantize=True, out_dtype=None):
    # Pure-JAX reference mirroring the PyTorch module (also used as the
    # fusion-friendly small-tensor path).
    out_dtype = x.dtype if out_dtype is None else out_dtype
    scale = (2 ** num_bits - 1) / clip_val
    zero_point = 0.0
    xf = jnp.clip(x.astype(jnp.float32), 0.0, float(clip_val))
    q = jnp.round(scale * xf - zero_point)
    if dequantize:
        q = (q + zero_point) / scale
    return q.astype(out_dtype)


def _choose_width(total):
    """Largest lane width (multiple of 128) that divides `total`; else pad to 128."""
    for w in (2048, 1024, 512, 256, 128):
        if total % w == 0:
            return w, False
    return LANE, True


def clipped_linear_quantization(x, num_bits, clip_val, dequantize=True,
                                out_dtype=None, use_pallas=None):
    """Forward pass of ClippedLinearQuantization.

    x: any shape (NCHW in the PyTorch module), float32 or bf16.
    out_dtype: defaults to x.dtype (matches PyTorch). For dequantize=False the
               caller may pass e.g. jnp.uint8 to cut output HBM traffic 4x.
    use_pallas: None -> auto (pure-JAX for tiny tensors so XLA can fuse).
    """
    # asymmetric_linear_quantization_params(num_bits, 0, clip_val, signed=False)
    n_levels = 2 ** num_bits - 1
    scale = n_levels / clip_val
    zero_point = float(round(scale * 0.0))  # = 0.0

    orig_shape = x.shape
    out_dtype = x.dtype if out_dtype is None else out_dtype
    total = int(x.size)

    if use_pallas is None:
        # Below ~16K elements the standalone kernel is pure launch overhead; let
        # XLA fuse the elementwise math into neighbors instead.
        use_pallas = total >= (1 << 14)
    if not use_pallas or total == 0:
        return _reference(x, num_bits, clip_val, dequantize, out_dtype).reshape(orig_shape)

    flat = x.reshape(-1)
    w, need_pad = _choose_width(total)
    if need_pad:
        padded_total = pl.cdiv(total, LANE) * LANE
        flat = jnp.pad(flat, (0, padded_total - total))  # tiny tail (<128 elems)
    x2d = flat.reshape(-1, w)
    rows = x2d.shape[0]

    # Tile sizing: ~TARGET_TILE_BYTES per input block, rows multiple of 8 (or the
    # full extent), and keep >=2 grid steps when possible for v7x's 2 TensorCores.
    itemsize = jnp.dtype(x.dtype).itemsize
    tile_rows = max(8, TARGET_TILE_BYTES // (w * itemsize))
    if rows > 16:
        half = max(8, ((rows // 2) // 8) * 8)
        tile_rows = min(tile_rows, half)
    tile_rows = min(tile_rows, rows)
    if tile_rows != rows:
        tile_rows = max(8, (tile_rows // 8) * 8)

    grid = (pl.cdiv(rows, tile_rows),)
    kernel = _make_kernel(clip_val, scale, zero_point, dequantize)

    out2d = pl.pallas_call(
        kernel,
        out_shape=jax.ShapeDtypeStruct((rows, w), out_dtype),
        grid_spec=pltpu.PrefetchScalarGridSpec(
            num_scalar_prefetch=0,
            grid=grid,
            in_specs=[pl.BlockSpec((tile_rows, w), lambda i: (i, 0))],
            out_specs=pl.BlockSpec((tile_rows, w), lambda i: (i, 0)),
        ),
        compiler_params=pltpu.CompilerParams(
            dimension_semantics=("parallel",),
        ),
    )(x2d)

    out = out2d.reshape(-1)
    if need_pad:
        out = out[:total]
    return out.reshape(orig_shape)


if __name__ == "__main__":
    num_bits = 4
    clip_val = 6.0   # ReLU6-style clipping
    key = jax.random.PRNGKey(0)

    # Primary test: small NCHW input, force the Pallas path.
    x = jax.random.normal(key, (2, 4, 16, 16), dtype=jnp.float32) * 4.0
    out = clipped_linear_quantization(x, num_bits, clip_val, dequantize=True,
                                      use_pallas=True)
    out = jax.block_until_ready(out)
    ref = _reference(x, num_bits, clip_val, dequantize=True)
    assert out.shape == x.shape and out.dtype == x.dtype
    assert jnp.allclose(out, ref, atol=1e-6), "mismatch vs reference (dequantize=True)"

    # Non-128-aligned shape exercises the tiny-tail-pad + ragged-block path.
    x2 = jax.random.normal(jax.random.PRNGKey(1), (2, 3, 7, 5), dtype=jnp.float32) * 4.0
    out2 = jax.block_until_ready(
        clipped_linear_quantization(x2, num_bits, clip_val, dequantize=True,
                                    use_pallas=True))
    assert jnp.allclose(out2, _reference(x2, num_bits, clip_val, True), atol=1e-6)

    # dequantize=False path (integer levels stored as float, matching PyTorch).
    out3 = jax.block_until_ready(
        clipped_linear_quantization(x, num_bits, clip_val, dequantize=False,
                                    use_pallas=True))
    assert jnp.allclose(out3, _reference(x, num_bits, clip_val, False), atol=1e-6)

    print("KERNEL_OK")
</pallas_src>

<mosaic_0001>
module attributes {stable_mosaic.version = 11 : i64} {
  func.func @kernel(%arg0: i32, %arg1: memref<1x2048xf32, #tpu.memory_space<vmem>>, %arg2: memref<1x2048xf32, #tpu.memory_space<vmem>>) attributes {dimension_semantics = [#tpu.dimension_semantics<parallel>], iteration_bounds = array<i64: 1>, scalar_prefetch = 0 : i64, scratch_operands = 0 : i64, tpu.core_type = #tpu.core_type<tc>, window_params = [{transform_indices = @transform_0, window_bounds = array<i64: 1, 2048>}, {transform_indices = @transform_1, window_bounds = array<i64: 1, 2048>}]} {
    %c0 = arith.constant 0 : index
    %c0_0 = arith.constant 0 : index
    %0 = vector.load %arg1[%c0, %c0_0] : memref<1x2048xf32, #tpu.memory_space<vmem>>, vector<1x2048xf32>
    %cst = arith.constant 0.000000e+00 : f32
    %cst_1 = arith.constant 6.000000e+00 : f32
    %1 = vector.broadcast %cst : f32 to vector<1x2048xf32>
    %2 = arith.maximumf %1, %0 : vector<1x2048xf32>
    %3 = vector.broadcast %cst_1 : f32 to vector<1x2048xf32>
    %4 = arith.minimumf %3, %2 : vector<1x2048xf32>
    %cst_2 = arith.constant 2.500000e+00 : f32
    %5 = vector.broadcast %cst_2 : f32 to vector<1x2048xf32>
    %6 = arith.mulf %5, %4 : vector<1x2048xf32>
    %cst_3 = arith.constant 0.000000e+00 : f32
    %7 = vector.broadcast %cst_3 : f32 to vector<1x2048xf32>
    %8 = arith.subf %6, %7 : vector<1x2048xf32>
    %9 = math.roundeven %8 : vector<1x2048xf32>
    %cst_4 = arith.constant 0.000000e+00 : f32
    %10 = vector.broadcast %cst_4 : f32 to vector<1x2048xf32>
    %11 = arith.addf %9, %10 : vector<1x2048xf32>
    %cst_5 = arith.constant 4.000000e-01 : f32
    %12 = vector.broadcast %cst_5 : f32 to vector<1x2048xf32>
    %13 = arith.mulf %11, %12 : vector<1x2048xf32>
    %c0_6 = arith.constant 0 : index
    %c0_7 = arith.constant 0 : index
    %14 = vector.load %arg2[%c0_6, %c0_7] : memref<1x2048xf32, #tpu.memory_space<vmem>>, vector<1x2048xf32>
    tpu.vector_store %arg2[%c0_6, %c0_7], %13 {strides = array<i32>} : memref<1x2048xf32, #tpu.memory_space<vmem>>, vector<1x2048xf32>,
    return
  }
  func.func @transform_0(%arg0: i32) -> (i32, i32) {
    %c0_i32 = arith.constant 0 : i32
    %c0_i32_0 = arith.constant 0 : i32
    return %arg0, %c0_i32 : i32, i32
  }
  func.func @transform_1(%arg0: i32) -> (i32, i32) {
    %c0_i32 = arith.constant 0 : i32
    %c0_i32_0 = arith.constant 0 : i32
    return %arg0, %c0_i32 : i32, i32
  }
}

</mosaic_0001>

<bundles_post_ra>
// kernel: tpu_custom_call.1
= control target key start
LH: loop header
LB: loop body
LE: loop exit
PB: predicated region body
PF: predicated region fallthrough
CT: control target
= control target key end

     0   :  { %6 = vsyncpa [#allocation3], 0  ;;  %s144_s0 = inlined_call_operand.hbm [shape: f32[1,2048], index: 0, kind: input, shape index: {}]   ;;  %s145_s1 = inlined_call_operand.hbm [shape: f32[1,2048], index: 1, kind: output, shape index: {}]  }
   0x1   :  { %7 = vsyncpa [#allocation4], 0  ;;  %s13_s8 = sshll.u32 %s144_s0, 4  ;;  %s126_s9 = smov [#allocation2]   ;;  %s14_s8 = int_to_ptr.hbm [resolvable:$true] %s13_s8 }
   0x2   :  { %s15_s10 = sshll.u32 %s126_s9, 4  ;;  %s16_s10 = int_to_ptr.vmem [resolvable:$true] %s15_s10 }
   0x3   :  { %18 = dma.hbm_to_vmem [thread:$0]  %s14_s8, 256, %s16_s10, [#allocation3]  }
   0x4   :  { %122 = dma.done.wait [#allocation3], 256  }
   0x5   :  { %123 = vsyncadd [#allocation3], 4294967040  ;;  %v23_v0 = vld [vmem:[#allocation2] sm:$0xff]  ;;  %v24_v1 = vld [vmem:[#allocation2 + $0x8] sm:$0xff]  ;;  %s127_s0 = smov [#allocation5]   ;;  %s46_s14 = sshll.u32 %s145_s1, 4  ;;  %s47_s14 = int_to_ptr.hbm [resolvable:$true] %s46_s14 }
   0x6   :  { %v25_v2 = vmax.f32 %v23_v0, 0.0  ;;  %v26_v3 = vmax.f32 %v24_v1, 0.0  ;;  %s44_s11 = sshll.u32 %s127_s0, 4  ;;  %s45_s11 = int_to_ptr.vmem [resolvable:$true] %s44_s11 }
   0x8   :  { %v27_v4 = vmin.f32 %v25_v2, 6.0  ;;  %v28_v5 = vmin.f32 %v26_v3, 6.0 }
   0xa   :  { %v29_v6 = vmul.f32 2.5, %v27_v4  ;;  %v30_v7 = vmul.f32 2.5, %v28_v5 }
   0xc   :  { %v58_v8 = vcvt.f32.s32 %v29_v6  ;;  %v56_v9 = vand.u32 2147483647, %v29_v6  ;;  %v66_v10 = vcvt.f32.s32 %v30_v7  ;;  %v61_v12 = vand.u32 2147483648, %v29_v6 }
   0xd   :  { %v64_v13 = vand.u32 2147483647, %v30_v7  ;;  %v69_v15 = vand.u32 2147483648, %v30_v7 }
   0xe   :  { %v59_v11 = vcvt.s32.f32 %v58_v8  ;;  %v67_v14 = vcvt.s32.f32 %v66_v10  ;;  %vm57_vm0 = vcmp.lt.f32.partialorder %v56_v9, 8388608.0 }
   0xf   :  { %vm65_vm1 = vcmp.lt.f32.partialorder %v64_v13, 8388608.0 }
  0x10   :  { %v60_v16 = vand.u32 2147483647, %v59_v11  ;;  %v68_v17 = vand.u32 2147483647, %v67_v14 }
  0x12   :  { %v62_v18 = vor.u32 %v61_v12, %v60_v16  ;;  %v70_v19 = vor.u32 %v69_v15, %v68_v17 }
  0x14   :  { %v63_v20 = vsel %vm57_vm0, %v62_v18, %v29_v6  ;;  %v71_v22 = vsel %vm65_vm1, %v70_v19, %v30_v7 }
  0x15   :  { %v35_v21 = vmul.f32 0.4, %v63_v20  ;;  %v36_v23 = vmul.f32 0.4, %v71_v22 }
  0x17   :  { %37 = vst [vmem:[#allocation5] sm:$0xff] %v35_v21 }
  0x18   :  { %38 = vst [vmem:[#allocation5 + $0x8] sm:$0xff] %v36_v23 }
  0x19   :  { %49 = dma.vmem_to_hbm [thread:$0]  %s45_s11, 256, %s47_s14, [#allocation4]  }
  0x1a   :  { %124 = dma.done.wait [#allocation4], 256  }
  0x1b   :  { %125 = vsyncadd [#allocation4], 4294967040 }
  0x1c   :  { %54 = vsyncpa [#allocation3], 1 }
  0x1d   :  { %55 = vsyncpa [#allocation4], 1 }

</bundles_post_ra>
